<compile_context>
chip_gen: v7x
topology: tpu7x:2x2x1
jax: 0.10.0
libtpu: 0.0.40
codegen_flags: <defaults>
</compile_context>

<pallas_src>
import functools

import jax
import jax.numpy as jnp
import numpy as np
from jax.experimental import pallas as pl
from jax.experimental.pallas import tpu as pltpu

_FC_HIDDEN_PAD = 128   # pad the 100-wide FC hidden layer to a full lane tile


# ------------------------------ fused kernel --------------------------------

def _make_fused_kernel(B, L0, K, C, n_layers, L3, H):
    """Builds the whole-network kernel for a static configuration."""
    pad = (K - 1) // 2

    def kernel(*refs):
        x_col_ref = refs[0]
        conv_refs = refs[1:1 + 2 * n_layers]                    # w, b per layer
        wf1_ref, bf1_ref, wf2_ref, bf2_ref = refs[1 + 2 * n_layers:
                                                  5 + 2 * n_layers]
        o_ref = refs[5 + 2 * n_layers]
        conv_sc, pad_sc, col_sc, flat_sc = refs[6 + 2 * n_layers:]

        # ---- conv layer 1 (Cin=1): im2col prebuilt in wrapper -> ONE dot ----
        h = jnp.dot(x_col_ref[...], conv_refs[0][...],
                    preferred_element_type=jnp.float32)
        conv_sc[0:B * L0, :] = jnp.maximum(h + conv_refs[1][...], 0.0)

        # ---- conv layers 2..n: MaxPool(2) -> pad -> im2col -> ONE dot -------
        L = L0
        for i in range(1, n_layers):
            Lh = L // 2
            # MaxPool1d(2): two strided sublane reads + elementwise max.
            # (pairs never cross batch rows: L is even, rows ordered (b, l))
            ev = conv_sc[pl.ds(0, B * Lh, stride=2), :]
            od = conv_sc[pl.ds(1, B * Lh, stride=2), :]
            pooled = jnp.maximum(ev, od).reshape(B, Lh, C)
            # Zero the whole padded-activation scratch (no stale-data reads),
            # then drop the pooled activations into the middle.
            pad_sc[...] = jnp.zeros_like(pad_sc)
            pad_sc[:, pad:pad + Lh, :] = pooled
            # im2col: K lane-offset blocks (column order k*C + c) ...
            for k in range(K):
                col_sc[0:B * Lh, k * C:(k + 1) * C] = (
                    pad_sc[:, k:k + Lh, :].reshape(B * Lh, C))
            # ... then a single MXU contraction of depth K*C.
            w_ref, b_ref = conv_refs[2 * i], conv_refs[2 * i + 1]
            acc = jnp.dot(col_sc[0:B * Lh, :], w_ref[...],
                          preferred_element_type=jnp.float32)
            conv_sc[0:B * Lh, :] = jnp.maximum(acc + b_ref[...], 0.0)
            L = Lh

        assert L // 2 == L3  # static (trace-time) sanity check

        # ---- FC head: final MaxPool fused into ONE 256-deep fc1 dot ---------
        # conv_sc[0:B*L] holds the last conv+ReLU output, rows ordered (b, l).
        # Pool pairs (2l, 2l+1) across both batch rows (stride = L) and write
        # the flatten length-major into flat_sc; wf1 was repacked to the
        # matching (L3*C, H) row order in prepare_params().
        for l in range(L3):
            ev = conv_sc[pl.ds(2 * l, B, stride=L), :]       # (B, C)
            od = conv_sc[pl.ds(2 * l + 1, B, stride=L), :]   # (B, C)
            flat_sc[:, l * C:(l + 1) * C] = jnp.maximum(ev, od)
        z = jnp.dot(flat_sc[...], wf1_ref[...],
                    preferred_element_type=jnp.float32)
        z = jnp.maximum(z + bf1_ref[...], 0.0)               # fc1 + ReLU
        # Dropout layers are identity at inference time.
        o_ref[...] = (jnp.dot(z, wf2_ref[...],
                              preferred_element_type=jnp.float32)
                      + bf2_ref[...])                         # fc2

    return kernel


# --------------------------- one-time weight prep ----------------------------

def prepare_params(params, input_size):
    """Repack PyTorch-layout weights into kernel-friendly layouts (run once)."""
    convs = params["conv"]
    n_layers = len(convs)
    C, _, K = convs[0][0].shape
    k_pad = ((K + 7) // 8) * 8

    packed = []
    # Layer 1 (Cin=1): (Cout,1,K) -> (k_pad, Cout) matching the wrapper im2col.
    w0, b0 = convs[0]
    w0p = jnp.pad(jnp.transpose(w0[:, 0, :]), ((0, k_pad - K), (0, 0)))
    packed += [w0p, b0.reshape(1, C)]
    # Layers 2..n: (Cout, Cin, K) -> (K*Cin, Cout), row order k*Cin + c.
    for (w, b) in convs[1:]:
        cin = w.shape[1]
        wp = jnp.transpose(w, (2, 1, 0)).reshape(K * cin, C)
        packed += [wp, b.reshape(1, C)]

    w1, b1, w2, b2 = params["fc"]         # (100,C*L3) (100,) (out,100) (out,)
    L3 = input_size // 2 ** n_layers
    H, h0 = _FC_HIDDEN_PAD, w1.shape[0]
    # Fold PyTorch's channel-major x.view(B,-1) flatten into w1: rows become
    # length-major (l*C + c); zero-pad the hidden dim 100 -> 128 (padded hidden
    # units are exactly 0 after ReLU and multiply zero fc2 columns).
    w1p = jnp.pad(w1, ((0, H - h0), (0, 0))).reshape(H, C, L3)
    w1p = jnp.transpose(w1p, (2, 1, 0)).reshape(L3 * C, H)
    b1p = jnp.pad(b1, (0, H - h0)).reshape(1, H)
    w2p = jnp.transpose(jnp.pad(w2, ((0, 0), (0, H - h0))))   # (H, out)
    b2p = b2.reshape(1, -1)
    return {"conv": packed, "fc": (w1p, b1p, w2p, b2p)}


# ------------------------------- jitted forward ------------------------------

@functools.partial(jax.jit, static_argnames=("kernel_size",))
def optimized_cnn_forward(x_ncl, prepped, *, kernel_size):
    """x_ncl: (B, 1, L) exactly as the PyTorch module's forward expects."""
    B, cin, L0 = x_ncl.shape
    K = kernel_size
    pad = (K - 1) // 2
    conv_ops = prepped["conv"]
    n_layers = len(conv_ops) // 2
    k_pad, C = conv_ops[0].shape
    w1p, b1p, w2p, b2p = prepped["fc"]
    H = w1p.shape[1]
    out_dim = w2p.shape[1]
    L3 = L0 // 2 ** n_layers
    L1 = L0 // 2

    assert cin == 1, "OptimizedCNN's first conv expects a single input channel"
    assert K % 2 == 1, "'same' padding formula assumes odd kernel_size"
    assert L0 % (2 ** n_layers) == 0, "every MaxPool1d(2) must see an even length"
    assert w1p.shape[0] == L3 * C

    # Layer-1 im2col built here (layout plumbing only, fused by XLA under jit):
    # column k holds the input shifted by tap k; zero-padded to k_pad lanes.
    xp = jnp.pad(x_ncl[:, 0, :], ((0, 0), (pad, pad)))          # (B, L0+2*pad)
    x_col = jnp.stack([xp[:, k:k + L0] for k in range(K)], axis=-1)
    x_col = jnp.pad(x_col.reshape(B * L0, K), ((0, 0), (0, k_pad - K)))

    operands = [x_col, *conv_ops, w1p, b1p, w2p, b2p]

    # Advisory cost estimate so XLA can overlap this call with its neighbours.
    flops = 2 * B * L0 * k_pad * C + 2 * B * L3 * C * H + 2 * B * H * out_dim
    Li = L0
    for _ in range(1, n_layers):
        Li //= 2
        flops += 2 * B * Li * K * C * C
    bytes_accessed = 4 * (sum(int(np.prod(o.shape)) for o in operands)
                          + B * out_dim)

    return pl.pallas_call(
        _make_fused_kernel(B, L0, K, C, n_layers, L3, H),
        out_shape=jax.ShapeDtypeStruct((B, out_dim), jnp.float32),
        in_specs=[pl.BlockSpec(memory_space=pltpu.MemorySpace.VMEM)] * len(operands),
        out_specs=pl.BlockSpec(memory_space=pltpu.MemorySpace.VMEM),
        scratch_shapes=[
            pltpu.VMEM((B * L0, C), jnp.float32),            # conv/ReLU outputs
            pltpu.VMEM((B, L1 + 2 * pad, C), jnp.float32),   # zero-padded pooled acts
            pltpu.VMEM((B * L1, K * C), jnp.float32),        # im2col staging
            pltpu.VMEM((B, L3 * C), jnp.float32),            # pooled flatten for fc1
        ],
        cost_estimate=pl.CostEstimate(flops=flops, transcendentals=0,
                                      bytes_accessed=bytes_accessed),
    )(*operands)


# -------------------------- deterministic parameters -------------------------

def init_params(key, input_size, conv_filters, kernel_size, num_conv_layers,
                output_size):
    # TODO(synk): the original script loads X_test from a .pt file only to get
    # input_size; here input_size is a small synthetic constant.
    params = {"conv": [], "fc": None}
    for i in range(num_conv_layers):
        cin = 1 if i == 0 else conv_filters
        key, kw, kb = jax.random.split(key, 3)
        bound = 1.0 / np.sqrt(cin * kernel_size)
        w = jax.random.uniform(kw, (conv_filters, cin, kernel_size),
                               jnp.float32, -bound, bound)
        b = jax.random.uniform(kb, (conv_filters,), jnp.float32, -bound, bound)
        params["conv"].append((w, b))

    fc_in = conv_filters * (input_size // 2 ** num_conv_layers)
    key, k1, k2, k3, k4 = jax.random.split(key, 5)
    bound1 = 1.0 / np.sqrt(fc_in)
    w1 = jax.random.uniform(k1, (100, fc_in), jnp.float32, -bound1, bound1)
    b1 = jax.random.uniform(k2, (100,), jnp.float32, -bound1, bound1)
    bound2 = 1.0 / np.sqrt(100)
    w2 = jax.random.uniform(k3, (output_size, 100), jnp.float32, -bound2, bound2)
    b2 = jax.random.uniform(k4, (output_size,), jnp.float32, -bound2, bound2)
    params["fc"] = (w1, b1, w2, b2)
    return params


# ----------------------------- pure-JAX reference ----------------------------

def reference_forward(x_ncl, params):
    h = x_ncl
    for (w, b) in params["conv"]:
        h = jax.lax.conv_general_dilated(
            h, w, window_strides=(1,), padding="SAME",
            dimension_numbers=("NCH", "OIH", "NCH"))
        h = h + b[None, :, None]
        h = jnp.maximum(h, 0.0)
        h = jax.lax.reduce_window(h, -jnp.inf, jax.lax.max,
                                  (1, 1, 2), (1, 1, 2), "VALID")
    h = h.reshape(h.shape[0], -1)
    w1, b1, w2, b2 = params["fc"]
    h = jnp.maximum(h @ w1.T + b1, 0.0)
    return h @ w2.T + b2


# ------------------------------------ main ------------------------------------

if __name__ == "__main__":
    B = 2
    input_size = 32          # small synthetic stand-in for X_test.size(1)
    conv_filters = 64
    kernel_size = 5
    num_conv_layers = 3
    output_size = 1

    key = jax.random.PRNGKey(0)
    key, kx = jax.random.split(key)
    x = jax.random.normal(kx, (B, 1, input_size), jnp.float32)  # (B, 1, L) NCL
    params = init_params(key, input_size, conv_filters, kernel_size,
                         num_conv_layers, output_size)
    prepped = prepare_params(params, input_size)

    out = jax.block_until_ready(
        optimized_cnn_forward(x, prepped, kernel_size=kernel_size))

    ref = jax.block_until_ready(reference_forward(x, params))
    np.testing.assert_allclose(np.asarray(out), np.asarray(ref),
                               rtol=1e-4, atol=1e-4)
    assert out.shape == (B, output_size)
    print("KERNEL_OK")
</pallas_src>

<mosaic_0001>
module attributes {stable_mosaic.version = 11 : i64} {
  func.func @kernel(%arg0: memref<64x8xf32, #tpu.memory_space<vmem>>, %arg1: memref<8x64xf32, #tpu.memory_space<vmem>>, %arg2: memref<1x64xf32, #tpu.memory_space<vmem>>, %arg3: memref<320x64xf32, #tpu.memory_space<vmem>>, %arg4: memref<1x64xf32, #tpu.memory_space<vmem>>, %arg5: memref<320x64xf32, #tpu.memory_space<vmem>>, %arg6: memref<1x64xf32, #tpu.memory_space<vmem>>, %arg7: memref<256x128xf32, #tpu.memory_space<vmem>>, %arg8: memref<1x128xf32, #tpu.memory_space<vmem>>, %arg9: memref<128x1xf32, #tpu.memory_space<vmem>>, %arg10: memref<1x1xf32, #tpu.memory_space<vmem>>, %arg11: memref<2x1xf32, #tpu.memory_space<vmem>>, %arg12: memref<64x64xf32, #tpu.memory_space<vmem>>, %arg13: memref<2x20x64xf32, #tpu.memory_space<vmem>>, %arg14: memref<32x320xf32, #tpu.memory_space<vmem>>, %arg15: memref<2x256xf32, #tpu.memory_space<vmem>>) attributes {dimension_semantics = [], scalar_prefetch = 0 : i64, scratch_operands = 4 : i64, tpu.core_type = #tpu.core_type<tc>} {
    %c0 = arith.constant 0 : index
    %c0_0 = arith.constant 0 : index
    %0 = vector.load %arg0[%c0, %c0_0] : memref<64x8xf32, #tpu.memory_space<vmem>>, vector<64x8xf32>
    %c0_1 = arith.constant 0 : index
    %c0_2 = arith.constant 0 : index
    %1 = vector.load %arg1[%c0_1, %c0_2] : memref<8x64xf32, #tpu.memory_space<vmem>>, vector<8x64xf32>
    %cst = arith.constant dense<0.000000e+00> : vector<64x64xf32>
    %2 = tpu.matmul %0, %1, %cst {dimension_numbers = #tpu.dot_dimension_numbers<[1], [0], [0], [1], [0, 0, 1, 1], [], []>} : vector<64x8xf32>, vector<8x64xf32>, vector<64x64xf32> -> vector<64x64xf32>
    %c0_3 = arith.constant 0 : index
    %c0_4 = arith.constant 0 : index
    %3 = vector.load %arg2[%c0_3, %c0_4] : memref<1x64xf32, #tpu.memory_space<vmem>>, vector<1x64xf32>
    %4 = vector.broadcast %3 : vector<1x64xf32> to vector<64x64xf32>
    %5 = arith.addf %2, %4 : vector<64x64xf32>
    %cst_5 = arith.constant 0.000000e+00 : f32
    %6 = vector.broadcast %cst_5 : f32 to vector<64x64xf32>
    %7 = arith.maximumf %5, %6 : vector<64x64xf32>
    %c0_6 = arith.constant 0 : index
    %c0_7 = arith.constant 0 : index
    %8 = vector.load %arg12[%c0_6, %c0_7] : memref<64x64xf32, #tpu.memory_space<vmem>>, vector<64x64xf32>
    tpu.vector_store %arg12[%c0_6, %c0_7], %7 {strides = array<i32>} : memref<64x64xf32, #tpu.memory_space<vmem>>, vector<64x64xf32>,
    %c0_8 = arith.constant 0 : index
    %c0_9 = arith.constant 0 : index
    %9 = tpu.strided_load %arg12[%c0_8, %c0_9] {strides = array<i32: 2, 1>} : memref<64x64xf32, #tpu.memory_space<vmem>>, vector<32x64xf32>
    %c1 = arith.constant 1 : index
    %c0_10 = arith.constant 0 : index
    %10 = tpu.strided_load %arg12[%c1, %c0_10] {strides = array<i32: 2, 1>} : memref<64x64xf32, #tpu.memory_space<vmem>>, vector<32x64xf32>
    %11 = arith.maximumf %9, %10 : vector<32x64xf32>
    %12 = vector.shape_cast %11 : vector<32x64xf32> to vector<2x16x64xf32>
    %cst_11 = arith.constant 0.000000e+00 : f32
    %13 = vector.broadcast %cst_11 : f32 to vector<2x20x64xf32>
    %c0_12 = arith.constant 0 : index
    %c0_13 = arith.constant 0 : index
    %c0_14 = arith.constant 0 : index
    %14 = vector.load %arg13[%c0_12, %c0_13, %c0_14] : memref<2x20x64xf32, #tpu.memory_space<vmem>>, vector<2x20x64xf32>
    tpu.vector_store %arg13[%c0_12, %c0_13, %c0_14], %13 {strides = array<i32>} : memref<2x20x64xf32, #tpu.memory_space<vmem>>, vector<2x20x64xf32>,
    %c0_15 = arith.constant 0 : index
    %c2 = arith.constant 2 : index
    %c0_16 = arith.constant 0 : index
    %15 = vector.load %arg13[%c0_15, %c2, %c0_16] : memref<2x20x64xf32, #tpu.memory_space<vmem>>, vector<2x16x64xf32>
    tpu.vector_store %arg13[%c0_15, %c2, %c0_16], %12 {strides = array<i32>} : memref<2x20x64xf32, #tpu.memory_space<vmem>>, vector<2x16x64xf32>,
    %c0_17 = arith.constant 0 : index
    %c0_18 = arith.constant 0 : index
    %c0_19 = arith.constant 0 : index
    %16 = vector.load %arg13[%c0_17, %c0_18, %c0_19] : memref<2x20x64xf32, #tpu.memory_space<vmem>>, vector<2x16x64xf32>
    %17 = vector.shape_cast %16 : vector<2x16x64xf32> to vector<32x64xf32>
    %c0_20 = arith.constant 0 : index
    %c0_21 = arith.constant 0 : index
    %18 = vector.load %arg14[%c0_20, %c0_21] : memref<32x320xf32, #tpu.memory_space<vmem>>, vector<32x64xf32>
    tpu.vector_store %arg14[%c0_20, %c0_21], %17 {strides = array<i32>} : memref<32x320xf32, #tpu.memory_space<vmem>>, vector<32x64xf32>,
    %c0_22 = arith.constant 0 : index
    %c1_23 = arith.constant 1 : index
    %c0_24 = arith.constant 0 : index
    %19 = vector.load %arg13[%c0_22, %c1_23, %c0_24] : memref<2x20x64xf32, #tpu.memory_space<vmem>>, vector<2x16x64xf32>
    %20 = vector.shape_cast %19 : vector<2x16x64xf32> to vector<32x64xf32>
    %c0_25 = arith.constant 0 : index
    %c64 = arith.constant 64 : index
    %21 = vector.load %arg14[%c0_25, %c64] : memref<32x320xf32, #tpu.memory_space<vmem>>, vector<32x64xf32>
    tpu.vector_store %arg14[%c0_25, %c64], %20 {strides = array<i32>} : memref<32x320xf32, #tpu.memory_space<vmem>>, vector<32x64xf32>,
    %c0_26 = arith.constant 0 : index
    %c2_27 = arith.constant 2 : index
    %c0_28 = arith.constant 0 : index
    %22 = vector.load %arg13[%c0_26, %c2_27, %c0_28] : memref<2x20x64xf32, #tpu.memory_space<vmem>>, vector<2x16x64xf32>
    %23 = vector.shape_cast %22 : vector<2x16x64xf32> to vector<32x64xf32>
    %c0_29 = arith.constant 0 : index
    %c128 = arith.constant 128 : index
    %24 = vector.load %arg14[%c0_29, %c128] : memref<32x320xf32, #tpu.memory_space<vmem>>, vector<32x64xf32>
    tpu.vector_store %arg14[%c0_29, %c128], %23 {strides = array<i32>} : memref<32x320xf32, #tpu.memory_space<vmem>>, vector<32x64xf32>,
    %c0_30 = arith.constant 0 : index
    %c3 = arith.constant 3 : index
    %c0_31 = arith.constant 0 : index
    %25 = vector.load %arg13[%c0_30, %c3, %c0_31] : memref<2x20x64xf32, #tpu.memory_space<vmem>>, vector<2x16x64xf32>
    %26 = vector.shape_cast %25 : vector<2x16x64xf32> to vector<32x64xf32>
    %c0_32 = arith.constant 0 : index
    %c192 = arith.constant 192 : index
    %27 = vector.load %arg14[%c0_32, %c192] : memref<32x320xf32, #tpu.memory_space<vmem>>, vector<32x64xf32>
    tpu.vector_store %arg14[%c0_32, %c192], %26 {strides = array<i32>} : memref<32x320xf32, #tpu.memory_space<vmem>>, vector<32x64xf32>,
    %c0_33 = arith.constant 0 : index
    %c4 = arith.constant 4 : index
    %c0_34 = arith.constant 0 : index
    %28 = vector.load %arg13[%c0_33, %c4, %c0_34] : memref<2x20x64xf32, #tpu.memory_space<vmem>>, vector<2x16x64xf32>
    %29 = vector.shape_cast %28 : vector<2x16x64xf32> to vector<32x64xf32>
    %c0_35 = arith.constant 0 : index
    %c256 = arith.constant 256 : index
    %30 = vector.load %arg14[%c0_35, %c256] : memref<32x320xf32, #tpu.memory_space<vmem>>, vector<32x64xf32>
    tpu.vector_store %arg14[%c0_35, %c256], %29 {strides = array<i32>} : memref<32x320xf32, #tpu.memory_space<vmem>>, vector<32x64xf32>,
    %c0_36 = arith.constant 0 : index
    %c0_37 = arith.constant 0 : index
    %31 = vector.load %arg14[%c0_36, %c0_37] : memref<32x320xf32, #tpu.memory_space<vmem>>, vector<32x320xf32>
    %c0_38 = arith.constant 0 : index
    %c0_39 = arith.constant 0 : index
    %32 = vector.load %arg3[%c0_38, %c0_39] : memref<320x64xf32, #tpu.memory_space<vmem>>, vector<320x64xf32>
    %cst_40 = arith.constant dense<0.000000e+00> : vector<32x64xf32>
    %33 = tpu.matmul %31, %32, %cst_40 {dimension_numbers = #tpu.dot_dimension_numbers<[1], [0], [0], [1], [0, 0, 1, 1], [], []>} : vector<32x320xf32>, vector<320x64xf32>, vector<32x64xf32> -> vector<32x64xf32>
    %c0_41 = arith.constant 0 : index
    %c0_42 = arith.constant 0 : index
    %34 = vector.load %arg4[%c0_41, %c0_42] : memref<1x64xf32, #tpu.memory_space<vmem>>, vector<1x64xf32>
    %35 = vector.broadcast %34 : vector<1x64xf32> to vector<32x64xf32>
    %36 = arith.addf %33, %35 : vector<32x64xf32>
    %cst_43 = arith.constant 0.000000e+00 : f32
    %37 = vector.broadcast %cst_43 : f32 to vector<32x64xf32>
    %38 = arith.maximumf %36, %37 : vector<32x64xf32>
    %c0_44 = arith.constant 0 : index
    %c0_45 = arith.constant 0 : index
    %39 = vector.load %arg12[%c0_44, %c0_45] : memref<64x64xf32, #tpu.memory_space<vmem>>, vector<32x64xf32>
    tpu.vector_store %arg12[%c0_44, %c0_45], %38 {strides = array<i32>} : memref<64x64xf32, #tpu.memory_space<vmem>>, vector<32x64xf32>,
    %c0_46 = arith.constant 0 : index
    %c0_47 = arith.constant 0 : index
    %40 = tpu.strided_load %arg12[%c0_46, %c0_47] {strides = array<i32: 2, 1>} : memref<64x64xf32, #tpu.memory_space<vmem>>, vector<16x64xf32>
    %c1_48 = arith.constant 1 : index
    %c0_49 = arith.constant 0 : index
    %41 = tpu.strided_load %arg12[%c1_48, %c0_49] {strides = array<i32: 2, 1>} : memref<64x64xf32, #tpu.memory_space<vmem>>, vector<16x64xf32>
    %42 = arith.maximumf %40, %41 : vector<16x64xf32>
    %43 = vector.shape_cast %42 : vector<16x64xf32> to vector<2x8x64xf32>
    %cst_50 = arith.constant 0.000000e+00 : f32
    %44 = vector.broadcast %cst_50 : f32 to vector<2x20x64xf32>
    %c0_51 = arith.constant 0 : index
    %c0_52 = arith.constant 0 : index
    %c0_53 = arith.constant 0 : index
    %45 = vector.load %arg13[%c0_51, %c0_52, %c0_53] : memref<2x20x64xf32, #tpu.memory_space<vmem>>, vector<2x20x64xf32>
    tpu.vector_store %arg13[%c0_51, %c0_52, %c0_53], %44 {strides = array<i32>} : memref<2x20x64xf32, #tpu.memory_space<vmem>>, vector<2x20x64xf32>,
    %c0_54 = arith.constant 0 : index
    %c2_55 = arith.constant 2 : index
    %c0_56 = arith.constant 0 : index
    %46 = vector.load %arg13[%c0_54, %c2_55, %c0_56] : memref<2x20x64xf32, #tpu.memory_space<vmem>>, vector<2x8x64xf32>
    tpu.vector_store %arg13[%c0_54, %c2_55, %c0_56], %43 {strides = array<i32>} : memref<2x20x64xf32, #tpu.memory_space<vmem>>, vector<2x8x64xf32>,
    %c0_57 = arith.constant 0 : index
    %c0_58 = arith.constant 0 : index
    %c0_59 = arith.constant 0 : index
    %47 = vector.load %arg13[%c0_57, %c0_58, %c0_59] : memref<2x20x64xf32, #tpu.memory_space<vmem>>, vector<2x8x64xf32>
    %48 = vector.shape_cast %47 : vector<2x8x64xf32> to vector<16x64xf32>
    %c0_60 = arith.constant 0 : index
    %c0_61 = arith.constant 0 : index
    %49 = vector.load %arg14[%c0_60, %c0_61] : memref<32x320xf32, #tpu.memory_space<vmem>>, vector<16x64xf32>
    tpu.vector_store %arg14[%c0_60, %c0_61], %48 {strides = array<i32>} : memref<32x320xf32, #tpu.memory_space<vmem>>, vector<16x64xf32>,
    %c0_62 = arith.constant 0 : index
    %c1_63 = arith.constant 1 : index
    %c0_64 = arith.constant 0 : index
    %50 = vector.load %arg13[%c0_62, %c1_63, %c0_64] : memref<2x20x64xf32, #tpu.memory_space<vmem>>, vector<2x8x64xf32>
    %51 = vector.shape_cast %50 : vector<2x8x64xf32> to vector<16x64xf32>
    %c0_65 = arith.constant 0 : index
    %c64_66 = arith.constant 64 : index
    %52 = vector.load %arg14[%c0_65, %c64_66] : memref<32x320xf32, #tpu.memory_space<vmem>>, vector<16x64xf32>
    tpu.vector_store %arg14[%c0_65, %c64_66], %51 {strides = array<i32>} : memref<32x320xf32, #tpu.memory_space<vmem>>, vector<16x64xf32>,
    %c0_67 = arith.constant 0 : index
    %c2_68 = arith.constant 2 : index
    %c0_69 = arith.constant 0 : index
    %53 = vector.load %arg13[%c0_67, %c2_68, %c0_69] : memref<2x20x64xf32, #tpu.memory_space<vmem>>, vector<2x8x64xf32>
    %54 = vector.shape_cast %53 : vector<2x8x64xf32> to vector<16x64xf32>
    %c0_70 = arith.constant 0 : index
    %c128_71 = arith.constant 128 : index
    %55 = vector.load %arg14[%c0_70, %c128_71] : memref<32x320xf32, #tpu.memory_space<vmem>>, vector<16x64xf32>
    tpu.vector_store %arg14[%c0_70, %c128_71], %54 {strides = array<i32>} : memref<32x320xf32, #tpu.memory_space<vmem>>, vector<16x64xf32>,
    %c0_72 = arith.constant 0 : index
    %c3_73 = arith.constant 3 : index
    %c0_74 = arith.constant 0 : index
    %56 = vector.load %arg13[%c0_72, %c3_73, %c0_74] : memref<2x20x64xf32, #tpu.memory_space<vmem>>, vector<2x8x64xf32>
    %57 = vector.shape_cast %56 : vector<2x8x64xf32> to vector<16x64xf32>
    %c0_75 = arith.constant 0 : index
    %c192_76 = arith.constant 192 : index
    %58 = vector.load %arg14[%c0_75, %c192_76] : memref<32x320xf32, #tpu.memory_space<vmem>>, vector<16x64xf32>
    tpu.vector_store %arg14[%c0_75, %c192_76], %57 {strides = array<i32>} : memref<32x320xf32, #tpu.memory_space<vmem>>, vector<16x64xf32>,
    %c0_77 = arith.constant 0 : index
    %c4_78 = arith.constant 4 : index
    %c0_79 = arith.constant 0 : index
    %59 = vector.load %arg13[%c0_77, %c4_78, %c0_79] : memref<2x20x64xf32, #tpu.memory_space<vmem>>, vector<2x8x64xf32>
    %60 = vector.shape_cast %59 : vector<2x8x64xf32> to vector<16x64xf32>
    %c0_80 = arith.constant 0 : index
    %c256_81 = arith.constant 256 : index
    %61 = vector.load %arg14[%c0_80, %c256_81] : memref<32x320xf32, #tpu.memory_space<vmem>>, vector<16x64xf32>
    tpu.vector_store %arg14[%c0_80, %c256_81], %60 {strides = array<i32>} : memref<32x320xf32, #tpu.memory_space<vmem>>, vector<16x64xf32>,
    %c0_82 = arith.constant 0 : index
    %c0_83 = arith.constant 0 : index
    %62 = vector.load %arg14[%c0_82, %c0_83] : memref<32x320xf32, #tpu.memory_space<vmem>>, vector<16x320xf32>
    %c0_84 = arith.constant 0 : index
    %c0_85 = arith.constant 0 : index
    %63 = vector.load %arg5[%c0_84, %c0_85] : memref<320x64xf32, #tpu.memory_space<vmem>>, vector<320x64xf32>
    %cst_86 = arith.constant dense<0.000000e+00> : vector<16x64xf32>
    %64 = tpu.matmul %62, %63, %cst_86 {dimension_numbers = #tpu.dot_dimension_numbers<[1], [0], [0], [1], [0, 0, 1, 1], [], []>} : vector<16x320xf32>, vector<320x64xf32>, vector<16x64xf32> -> vector<16x64xf32>
    %c0_87 = arith.constant 0 : index
    %c0_88 = arith.constant 0 : index
    %65 = vector.load %arg6[%c0_87, %c0_88] : memref<1x64xf32, #tpu.memory_space<vmem>>, vector<1x64xf32>
    %66 = vector.broadcast %65 : vector<1x64xf32> to vector<16x64xf32>
    %67 = arith.addf %64, %66 : vector<16x64xf32>
    %cst_89 = arith.constant 0.000000e+00 : f32
    %68 = vector.broadcast %cst_89 : f32 to vector<16x64xf32>
    %69 = arith.maximumf %67, %68 : vector<16x64xf32>
    %c0_90 = arith.constant 0 : index
    %c0_91 = arith.constant 0 : index
    %70 = vector.load %arg12[%c0_90, %c0_91] : memref<64x64xf32, #tpu.memory_space<vmem>>, vector<16x64xf32>
    tpu.vector_store %arg12[%c0_90, %c0_91], %69 {strides = array<i32>} : memref<64x64xf32, #tpu.memory_space<vmem>>, vector<16x64xf32>,
    %c0_92 = arith.constant 0 : index
    %c0_93 = arith.constant 0 : index
    %71 = tpu.strided_load %arg12[%c0_92, %c0_93] {strides = array<i32: 8, 1>} : memref<64x64xf32, #tpu.memory_space<vmem>>, vector<2x64xf32>
    %c1_94 = arith.constant 1 : index
    %c0_95 = arith.constant 0 : index
    %72 = tpu.strided_load %arg12[%c1_94, %c0_95] {strides = array<i32: 8, 1>} : memref<64x64xf32, #tpu.memory_space<vmem>>, vector<2x64xf32>
    %73 = arith.maximumf %71, %72 : vector<2x64xf32>
    %c0_96 = arith.constant 0 : index
    %c0_97 = arith.constant 0 : index
    %74 = vector.load %arg15[%c0_96, %c0_97] : memref<2x256xf32, #tpu.memory_space<vmem>>, vector<2x64xf32>
    tpu.vector_store %arg15[%c0_96, %c0_97], %73 {strides = array<i32>} : memref<2x256xf32, #tpu.memory_space<vmem>>, vector<2x64xf32>,
    %c2_98 = arith.constant 2 : index
    %c0_99 = arith.constant 0 : index
    %75 = tpu.strided_load %arg12[%c2_98, %c0_99] {strides = array<i32: 8, 1>} : memref<64x64xf32, #tpu.memory_space<vmem>>, vector<2x64xf32>
    %c3_100 = arith.constant 3 : index
    %c0_101 = arith.constant 0 : index
    %76 = tpu.strided_load %arg12[%c3_100, %c0_101] {strides = array<i32: 8, 1>} : memref<64x64xf32, #tpu.memory_space<vmem>>, vector<2x64xf32>
    %77 = arith.maximumf %75, %76 : vector<2x64xf32>
    %c0_102 = arith.constant 0 : index
    %c64_103 = arith.constant 64 : index
    %78 = vector.load %arg15[%c0_102, %c64_103] : memref<2x256xf32, #tpu.memory_space<vmem>>, vector<2x64xf32>
    tpu.vector_store %arg15[%c0_102, %c64_103], %77 {strides = array<i32>} : memref<2x256xf32, #tpu.memory_space<vmem>>, vector<2x64xf32>,
    %c4_104 = arith.constant 4 : index
    %c0_105 = arith.constant 0 : index
    %79 = tpu.strided_load %arg12[%c4_104, %c0_105] {strides = array<i32: 8, 1>} : memref<64x64xf32, #tpu.memory_space<vmem>>, vector<2x64xf32>
    %c5 = arith.constant 5 : index
    %c0_106 = arith.constant 0 : index
    %80 = tpu.strided_load %arg12[%c5, %c0_106] {strides = array<i32: 8, 1>} : memref<64x64xf32, #tpu.memory_space<vmem>>, vector<2x64xf32>
    %81 = arith.maximumf %79, %80 : vector<2x64xf32>
    %c0_107 = arith.constant 0 : index
    %c128_108 = arith.constant 128 : index
    %82 = vector.load %arg15[%c0_107, %c128_108] : memref<2x256xf32, #tpu.memory_space<vmem>>, vector<2x64xf32>
    tpu.vector_store %arg15[%c0_107, %c128_108], %81 {strides = array<i32>} : memref<2x256xf32, #tpu.memory_space<vmem>>, vector<2x64xf32>,
    %c6 = arith.constant 6 : index
    %c0_109 = arith.constant 0 : index
    %83 = tpu.strided_load %arg12[%c6, %c0_109] {strides = array<i32: 8, 1>} : memref<64x64xf32, #tpu.memory_space<vmem>>, vector<2x64xf32>
    %c7 = arith.constant 7 : index
    %c0_110 = arith.constant 0 : index
    %84 = tpu.strided_load %arg12[%c7, %c0_110] {strides = array<i32: 8, 1>} : memref<64x64xf32, #tpu.memory_space<vmem>>, vector<2x64xf32>
    %85 = arith.maximumf %83, %84 : vector<2x64xf32>
    %c0_111 = arith.constant 0 : index
    %c192_112 = arith.constant 192 : index
    %86 = vector.load %arg15[%c0_111, %c192_112] : memref<2x256xf32, #tpu.memory_space<vmem>>, vector<2x64xf32>
    tpu.vector_store %arg15[%c0_111, %c192_112], %85 {strides = array<i32>} : memref<2x256xf32, #tpu.memory_space<vmem>>, vector<2x64xf32>,
    %c0_113 = arith.constant 0 : index
    %c0_114 = arith.constant 0 : index
    %87 = vector.load %arg15[%c0_113, %c0_114] : memref<2x256xf32, #tpu.memory_space<vmem>>, vector<2x256xf32>
    %c0_115 = arith.constant 0 : index
    %c0_116 = arith.constant 0 : index
    %88 = vector.load %arg7[%c0_115, %c0_116] : memref<256x128xf32, #tpu.memory_space<vmem>>, vector<256x128xf32>
    %cst_117 = arith.constant dense<0.000000e+00> : vector<2x128xf32>
    %89 = tpu.matmul %87, %88, %cst_117 {dimension_numbers = #tpu.dot_dimension_numbers<[1], [0], [0], [1], [0, 0, 1, 1], [], []>} : vector<2x256xf32>, vector<256x128xf32>, vector<2x128xf32> -> vector<2x128xf32>
    %c0_118 = arith.constant 0 : index
    %c0_119 = arith.constant 0 : index
    %90 = vector.load %arg8[%c0_118, %c0_119] : memref<1x128xf32, #tpu.memory_space<vmem>>, vector<1x128xf32>
    %91 = vector.broadcast %90 : vector<1x128xf32> to vector<2x128xf32>
    %92 = arith.addf %89, %91 : vector<2x128xf32>
    %cst_120 = arith.constant 0.000000e+00 : f32
    %93 = vector.broadcast %cst_120 : f32 to vector<2x128xf32>
    %94 = arith.maximumf %92, %93 : vector<2x128xf32>
    %c0_121 = arith.constant 0 : index
    %c0_122 = arith.constant 0 : index
    %95 = vector.load %arg9[%c0_121, %c0_122] : memref<128x1xf32, #tpu.memory_space<vmem>>, vector<128x1xf32>
    %cst_123 = arith.constant dense<0.000000e+00> : vector<2x1xf32>
    %96 = tpu.matmul %94, %95, %cst_123 {dimension_numbers = #tpu.dot_dimension_numbers<[1], [0], [0], [1], [0, 0, 1, 1], [], []>} : vector<2x128xf32>, vector<128x1xf32>, vector<2x1xf32> -> vector<2x1xf32>
    %c0_124 = arith.constant 0 : index
    %c0_125 = arith.constant 0 : index
    %97 = vector.load %arg10[%c0_124, %c0_125] : memref<1x1xf32, #tpu.memory_space<vmem>>, vector<1x1xf32>
    %98 = vector.broadcast %97 : vector<1x1xf32> to vector<2x1xf32>
    %99 = arith.addf %96, %98 : vector<2x1xf32>
    %c0_126 = arith.constant 0 : index
    %c0_127 = arith.constant 0 : index
    %100 = vector.load %arg11[%c0_126, %c0_127] : memref<2x1xf32, #tpu.memory_space<vmem>>, vector<2x1xf32>
    tpu.vector_store %arg11[%c0_126, %c0_127], %99 {strides = array<i32>} : memref<2x1xf32, #tpu.memory_space<vmem>>, vector<2x1xf32>,
    return
  }
}

</mosaic_0001>

<bundles_post_ra>
// kernel: optimized_cnn_forward.1
= control target key start
LH: loop header
LB: loop body
LE: loop exit
PB: predicated region body
PF: predicated region fallthrough
CT: control target
= control target key end

     0   :  { %vm56_vm0 = vcmask 64512   ;;  %vm194_vm1 = vcmask 523264   ;;  %v1517_v9 = vmov 0.0   ;;  %vm224_vm2 = vcmask 519168   ;;  %s1518_s30 = smov 64   ;;  %s2128_s1 = inlined_call_operand.vmem [shape: f32[8,64], index: 1, kind: input, shape index: {}]   ;;  %s2129_s0 = inlined_call_operand.vmem [shape: f32[64,8], index: 0, kind: input, shape index: {}]   ;;  %s2130_s3 = inlined_call_operand.vmem [shape: f32[320,64], index: 3, kind: input, shape index: {}]   ;;  %s2131_s2 = inlined_call_operand.vmem [shape: f32[1,64], index: 2, kind: input, shape index: {}]   ;;  %s2132_s5 = inlined_call_operand.vmem [shape: f32[320,64], index: 5, kind: input, shape index: {}]   ;;  %s2133_s4 = inlined_call_operand.vmem [shape: f32[1,64], index: 4, kind: input, shape index: {}]   ;;  %s2134_s7 = inlined_call_operand.vmem [shape: f32[256,128], index: 7, kind: input, shape index: {}]   ;;  %s2135_s6 = inlined_call_operand.vmem [shape: f32[1,64], index: 6, kind: input, shape index: {}]   ;;  %s2136_s9 = inlined_call_operand.vmem [shape: f32[128,1], index: 9, kind: input, shape index: {}]   ;;  %s2137_s10 = inlined_call_operand.<no memory space> [shape: f32[1,1], index: 10, kind: input, shape index: {}]   ;;  %s2138_s8 = inlined_call_operand.vmem [shape: f32[1,128], index: 8, kind: input, shape index: {}]   ;;  %s2139_s11 = inlined_call_operand.vmem [shape: f32[2,1], index: 11, kind: output, shape index: {}]  }
   0x1   :  { %v48_v0 = vld [vmem:[%s2128_s1] sm:$0xff]  ;;  %v41_v2 = vld [vmem:[%s2129_s0 + $0x8] sm:$0xff]  ;;  %v42_v3 = vld [vmem:[%s2129_s0 + $0x10] sm:$0xff]  ;;  %223 = vst.msk [vmem:[#allocation3 + $0x8] sm:$0xff] %vm194_vm1, %v1517_v9  ;;  %vm261_vm3 = vcmask 1048064   ;;  %vm821_vm4 = vcmask 517120  }
   0x2   :  { %v40_v1 = vld [vmem:[%s2129_s0] sm:$0xff]  ;;  %1270 = vmatprep.subr.mxu0 %v48_v0  ;;  %v43_v4 = vld [vmem:[%s2129_s0 + $0x18] sm:$0xff]  ;;  %v45_v6 = vld [vmem:[%s2129_s0 + $0x28] sm:$0xff]  ;;  %222 = vst.msk [vmem:[#allocation3] sm:$0xff] %vm194_vm1, %v1517_v9  ;;  %vm839_vm5 = vcmask 1041920   ;;  %vm1521_vm6 = vmmov 0  }
   0x3   :  { %1272 = vmatprep.mubr.msk.f32.mxu0 %vm56_vm0, %v40_v1  ;;  %1271 = vmatpush3.msra.mxu0 %v48_v0  ;;  %v44_v5 = vld [vmem:[%s2129_s0 + $0x20] sm:$0xff]  ;;  %v46_v7 = vld [vmem:[%s2129_s0 + $0x30] sm:$0xff]  ;;  %v47_v8 = vld [vmem:[%s2129_s0 + $0x38] sm:$0xff]  ;;  %226 = vst.msk [vmem:[#allocation3 + $0x18] sm:$0xff] %vm194_vm1, %v1517_v9  ;;  %vm1079_vm7 = vcmask 1024  }
   0x4   :  { %1273 = vmatmul.mubr.msk.f32.vlgmr.msra.gmra.mrb[0].mxu0 %vm56_vm0, %v41_v2  ;;  %227 = vst.msk [vmem:[#allocation3 + $0x20] sm:$0xff] %vm194_vm1, %v1517_v9  ;;  %v350_v10 = vld [vmem:[%s2130_s3 + $0x100] sm:$0xff]  ;;  %v351_v11 = vld [vmem:[%s2130_s3 + $0x108] sm:$0xff]  ;;  %v352_v13 = vld [vmem:[%s2130_s3 + $0x110] sm:$0xff] }
   0x5   :  { %1275 = vmatprep.mubr.msk.f32.mxu0 %vm56_vm0, %v42_v3  ;;  %v1392_v12 = vpack.c.bf16 %v351_v11, %v350_v10  ;;  %225 = vst.msk [vmem:[#allocation3 + $0x10] sm:$0xf] %vm224_vm2, %v1517_v9  ;;  %228 = vst.msk [vmem:[#allocation3 + $0x28] sm:$0xf] %vm224_vm2, %v1517_v9  ;;  %v353_v14 = vld [vmem:[%s2130_s3 + $0x118] sm:$0xff]  ;;  %v354_v16 = vld [vmem:[%s2130_s3 + $0x120] sm:$0xff] }
   0x6   :  { %v1396_v15 = vpack.c.bf16 %v353_v14, %v352_v13  ;;  %v355_v17 = vld [vmem:[%s2130_s3 + $0x128] sm:$0xff]  ;;  %v356_v19 = vld [vmem:[%s2130_s3 + $0x130] sm:$0xff]  ;;  %v357_v20 = vld [vmem:[%s2130_s3 + $0x138] sm:$0xff] }
   0x7   :  { %1393 = vmatprep.subr.bf16.mxu0 %v1392_v12  ;;  %v1400_v18 = vpack.c.bf16 %v355_v17, %v354_v16  ;;  %v1404_v21 = vpack.c.bf16 %v357_v20, %v356_v19  ;;  %v334_v22 = vld [vmem:[%s2130_s3 + $0x80] sm:$0xff]  ;;  %v335_v23 = vld [vmem:[%s2130_s3 + $0x88] sm:$0xff]  ;;  %v336_v27 = vld [vmem:[%s2130_s3 + $0x90] sm:$0xff] }
   0x8   :  { %1276 = vmatmul.mubr.msk.f32.gmra.mrb[2].mxu0 %vm56_vm0, %v43_v4  ;;  %v318_v24 = vld [vmem:[%s2130_s3] sm:$0xff]  ;;  %v1360_v25 = vpack.c.bf16 %v335_v23, %v334_v22  ;;  %v319_v26 = vld [vmem:[%s2130_s3 + $0x8] sm:$0xff]  ;;  %v337_v28 = vld [vmem:[%s2130_s3 + $0x98] sm:$0xff] }
   0x9   :  { %1278 = vmatprep.mubr.msk.f32.mxu0 %vm56_vm0, %v44_v5  ;;  %1395 = vmatpush3.bf16.msra.mxu0 %v1392_v12  ;;  %v1362_v29 = vpack.c.bf16 %v319_v26, %v318_v24  ;;  %v1364_v30 = vpack.c.bf16 %v337_v28, %v336_v27  ;;  %v320_v31 = vld [vmem:[%s2130_s3 + $0x10] sm:$0xff]  ;;  %v321_v32 = vld [vmem:[%s2130_s3 + $0x18] sm:$0xff]  ;;  %v338_v33 = vld [vmem:[%s2130_s3 + $0xa0] sm:$0xff] }
   0xa   :  { %1397 = vmatprep.subr.bf16.mxu0 %v1396_v15  ;;  %1361 = vmatprep.subr.bf16.mxu1 %v1360_v25  ;;  %v339_v34 = vld [vmem:[%s2130_s3 + $0xa8] sm:$0xff]  ;;  %v1366_v35 = vpack.c.bf16 %v321_v32, %v320_v31  ;;  %v322_v37 = vld [vmem:[%s2130_s3 + $0x20] sm:$0xff]  ;;  %v340_v39 = vld [vmem:[%s2130_s3 + $0xb0] sm:$0xff] }
   0xb   :  { %1363 = vmatpush3.bf16.msra.mxu1 %v1362_v29  ;;  %v1368_v36 = vpack.c.bf16 %v339_v34, %v338_v33  ;;  %v323_v38 = vld [vmem:[%s2130_s3 + $0x28] sm:$0xff]  ;;  %v341_v40 = vld [vmem:[%s2130_s3 + $0xb8] sm:$0xff]  ;;  %v324_v43 = vld [vmem:[%s2130_s3 + $0x30] sm:$0xff] }
   0xc   :  { %1279 = vmatmul.mubr.msk.f32.gmra.mrb[4].mxu0 %vm56_vm0, %v45_v6  ;;  %1365 = vmatprep.subr.bf16.mxu1 %v1364_v30  ;;  %v1370_v41 = vpack.c.bf16 %v323_v38, %v322_v37  ;;  %v1372_v42 = vpack.c.bf16 %v341_v40, %v340_v39  ;;  %v325_v44 = vld [vmem:[%s2130_s3 + $0x38] sm:$0xff]  ;;  %v342_v45 = vld [vmem:[%s2130_s3 + $0xc0] sm:$0xff]  ;;  %v343_v46 = vld [vmem:[%s2130_s3 + $0xc8] sm:$0xff] }
   0xd   :  { %1281 = vmatprep.mubr.msk.f32.mxu0 %vm56_vm0, %v46_v7  ;;  %1399 = vmatpush3.bf16.msra.mxu0 %v1396_v15  ;;  %v1374_v47 = vpack.c.bf16 %v325_v44, %v324_v43  ;;  %v1376_v48 = vpack.c.bf16 %v343_v46, %v342_v45  ;;  %v326_v49 = vld [vmem:[%s2130_s3 + $0x40] sm:$0xff]  ;;  %v327_v50 = vld [vmem:[%s2130_s3 + $0x48] sm:$0xff]  ;;  %v344_v13 = vld [vmem:[%s2130_s3 + $0xd0] sm:$0xff] }
   0xe   :  { %1401 = vmatprep.subr.bf16.mxu0 %v1400_v18  ;;  %v1378_v51 = vpack.c.bf16 %v327_v50, %v326_v49  ;;  %v1085_v52 = vld [vmem:[%s2131_s2] ss:$0 sm:$0xff]  ;;  %v345_v16 = vld [vmem:[%s2130_s3 + $0xd8] sm:$0xff]  ;;  %v328_v17 = vld [vmem:[%s2130_s3 + $0x50] sm:$0xff] }
   0xf   :  { %1367 = vmatpush3.bf16.msra.mxu1 %v1366_v35  ;;  %v1380_v20 = vpack.c.bf16 %v345_v16, %v344_v13  ;;  %v346_v26 = vld [vmem:[%s2130_s3 + $0xe0] sm:$0xff]  ;;  %v347_v27 = vld [vmem:[%s2130_s3 + $0xe8] sm:$0xff]  ;;  %v348_v35 = vld [vmem:[%s2130_s3 + $0xf0] sm:$0xff] }
  0x10   :  { %1282 = vmatmul.mubr.msk.f32.gmra.mrb[6].mxu0 %vm56_vm0, %v47_v8  ;;  %1369 = vmatprep.subr.bf16.mxu1 %v1368_v36  ;;  %v1384_v28 = vpack.c.bf16 %v347_v27, %v346_v26  ;;  %v330_v29 = vld [vmem:[%s2130_s3 + $0x60] sm:$0xff]  ;;  %v331_v30 = vld [vmem:[%s2130_s3 + $0x68] sm:$0xff]  ;;  %v349_v36 = vld [vmem:[%s2130_s3 + $0xf8] sm:$0xff] }
  0x11   :  { %1403 = vmatpush3.bf16.msra.mxu0 %v1400_v18  ;;  %v329_v18 = vld [vmem:[%s2130_s3 + $0x58] sm:$0xff]  ;;  %v1386_v31 = vpack.c.bf16 %v331_v30, %v330_v29  ;;  %v1388_v39 = vpack.c.bf16 %v349_v36, %v348_v35  ;;  %v332_v40 = vld [vmem:[%s2130_s3 + $0x70] sm:$0xff]  ;;  %v644_v26 = vld [vmem:[%s2132_s5 + $0x108] sm:$0xff] }
  0x12   :  { %1405 = vmatprep.subr.bf16.mxu0 %v1404_v21  ;;  %v646_v29 = vld [vmem:[%s2132_s5 + $0x118] sm:$0xff] }
  0x13   :  { %1371 = vmatpush3.bf16.msra.mxu1 %v1370_v41  ;;  %v333_v41 = vld [vmem:[%s2130_s3 + $0x78] sm:$0xff] }
  0x14   :  { %1373 = vmatprep.subr.bf16.mxu1 %v1372_v42  ;;  %v1390_v44 = vpack.c.bf16 %v333_v41, %v332_v40  ;;  %v650_v35 = vld [vmem:[%s2132_s5 + $0x138] sm:$0xff]  ;;  %v612_v41 = vld [vmem:[%s2132_s5 + $0x8] sm:$0xff] }
  0x15   :  { %1407 = vmatpush3.bf16.msra.mxu0 %v1404_v21  ;;  %v1382_v21 = vpack.c.bf16 %v329_v18, %v328_v17 }
  0x17   :  { %1375 = vmatpush3.bf16.msra.mxu1 %v1374_v47 }
  0x18   :  { %1377 = vmatprep.subr.bf16.mxu1 %v1376_v48 }
  0x1b   :  { %1379 = vmatpush3.bf16.msra.mxu1 %v1378_v51 }
  0x1c   :  { %1381 = vmatprep.subr.bf16.mxu1 %v1380_v20 }
  0x1f   :  { %1383 = vmatpush3.bf16.msra.mxu1 %v1382_v21 }
  0x20   :  { %1385 = vmatprep.subr.bf16.mxu1 %v1384_v28  ;;  %v645_v28 = vld [vmem:[%s2132_s5 + $0x110] sm:$0xff] }
  0x21   :  { %v1444_v30 = vpack.c.bf16 %v646_v29, %v645_v28 }
  0x23   :  { %1387 = vmatpush3.bf16.msra.mxu1 %v1386_v31  ;;  %v647_v31 = vld [vmem:[%s2132_s5 + $0x120] sm:$0xff] }
  0x24   :  { %1389 = vmatprep.subr.bf16.mxu1 %v1388_v39  ;;  %v611_v39 = vld [vmem:[%s2132_s5] sm:$0xff] }
  0x27   :  { %1391 = vmatpush3.bf16.msra.mxu1 %v1390_v44  ;;  %v1410_v44 = vpack.c.bf16 %v612_v41, %v611_v39  ;;  %v642_v41 = vld [vmem:[%s2132_s5 + $0xf8] sm:$0xff] }
  0xd7   :  { %v1274_v53 = vpop.f32.mrb[0].mxu0 }
  0xd8   :  { %v153_v54 = vadd.f32 %v1274_v53, %v1085_v52  ;;  %v147_v55 = vpop.f32.mrb[1].mxu0 }
  0xd9   :  { %v148_v56 = vadd.f32 %v1085_v52, %v147_v55 }
  0xda   :  { %v187_v57 = vmax.f32 %v153_v54, 0.0 }
  0xdb   :  { %v186_v58 = vmax.f32 %v148_v56, 0.0  ;;  %v1277_v59 = vpop.f32.mrb[2].mxu0 }
  0xdc   :  { %196 = vst.msk [vmem:[#allocation2 + $0x8] sm:$0xff] %vm194_vm1, %v187_v57  ;;  %v163_v60 = vadd.f32 %v1277_v59, %v1085_v52  ;;  %v157_v61 = vpop.f32.mrb[3].mxu0 }
  0xdd   :  { %195 = vst.msk [vmem:[#allocation2] sm:$0xff] %vm194_vm1, %v186_v58  ;;  %v158_v62 = vadd.f32 %v1085_v52, %v157_v61 }
  0xde   :  { %v189_v63 = vmax.f32 %v163_v60, 0.0 }
  0xdf   :  { %v188_v0 = vmax.f32 %v158_v62, 0.0  ;;  %v1280_v1 = vpop.f32.mrb[4].mxu0 }
  0xe0   :  { %198 = vst.msk [vmem:[#allocation2 + $0x18] sm:$0xff] %vm194_vm1, %v189_v63  ;;  %v173_v2 = vadd.f32 %v1280_v1, %v1085_v52  ;;  %v167_v3 = vpop.f32.mrb[5].mxu0 }
  0xe1   :  { %197 = vst.msk [vmem:[#allocation2 + $0x10] sm:$0xff] %vm194_vm1, %v188_v0  ;;  %v168_v4 = vadd.f32 %v1085_v52, %v167_v3 }
  0xe2   :  { %v191_v5 = vmax.f32 %v173_v2, 0.0 }
  0xe3   :  { %v190_v6 = vmax.f32 %v168_v4, 0.0  ;;  %v1283_v7 = vpop.f32.mrb[6].mxu0 }
  0xe4   :  { %v203_v8 = vld [vmem:[#allocation2] ss:$2 sm:$0xff]  ;;  %v211_v10 = vld [vmem:[#allocation2 + $0x1] ss:$2 sm:$0xff]  ;;  %200 = vst.msk [vmem:[#allocation2 + $0x28] sm:$0xff] %vm194_vm1, %v191_v5  ;;  %v183_v11 = vadd.f32 %v1283_v7, %v1085_v52  ;;  %v177_v12 = vpop.f32.mrb[7].mxu0 }
  0xe5   :  { %v218_v14 = vmax.f32 %v203_v8, %v211_v10  ;;  %199 = vst.msk [vmem:[#allocation2 + $0x20] sm:$0xff] %vm194_vm1, %v190_v6  ;;  %v178_v15 = vadd.f32 %v1085_v52, %v177_v12 }
  0xe6   :  { %v193_v19 = vmax.f32 %v183_v11, 0.0 }
  0xe7   :  { %v192_v22 = vmax.f32 %v178_v15, 0.0  ;;  %229 = vst.msk [vmem:[#allocation3 + $0x2] sm:$0xff] %vm194_vm1, %v218_v14 }
  0xe8   :  { %v205_v23 = vld [vmem:[#allocation2 + $0x10] ss:$2 sm:$0xff]  ;;  %v213_v24 = vld [vmem:[#allocation2 + $0x11] ss:$2 sm:$0xff]  ;;  %202 = vst.msk [vmem:[#allocation2 + $0x38] sm:$0xff] %vm194_vm1, %v193_v19 }
  0xe9   :  { %v219_v25 = vmax.f32 %v205_v23, %v213_v24  ;;  %201 = vst.msk [vmem:[#allocation2 + $0x30] sm:$0xff] %vm194_vm1, %v192_v22 }
  0xeb   :  { %230 = vst.msk [vmem:[#allocation3 + $0xa] sm:$0xff] %vm194_vm1, %v219_v25  ;;  %v643_v25 = vld [vmem:[%s2132_s5 + $0x100] sm:$0xff] }
  0xec   :  { %v207_v32 = vld [vmem:[#allocation2 + $0x20] ss:$2 sm:$0xff]  ;;  %v215_v33 = vld [vmem:[#allocation2 + $0x21] ss:$2 sm:$0xff]  ;;  %v1440_v27 = vpack.c.bf16 %v644_v26, %v643_v25 }
  0xed   :  { %v220_v34 = vmax.f32 %v207_v32, %v215_v33  ;;  %v648_v32 = vld [vmem:[%s2132_s5 + $0x128] sm:$0xff] }
  0xee   :  { %v266_v37 = vld [vmem:[#allocation3 + $0x2] sm:$0xff]  ;;  %1441 = vmatprep.subr.bf16.mxu1 %v1440_v27  ;;  %v1448_v33 = vpack.c.bf16 %v648_v32, %v647_v31 }
  0xef   :  { %v233_v38 = vld [vmem:[#allocation3] sm:$0xff]  ;;  %231 = vst.msk [vmem:[#allocation3 + $0x1a] sm:$0xff] %vm194_vm1, %v220_v34  ;;  %270 = vst.msk [vmem:[#allocation4 + $0x8] sm:$0xff] %vm194_vm1, %v266_v37  ;;  %v649_v34 = vld [vmem:[%s2132_s5 + $0x130] sm:$0xff] }
  0xf0   :  { %237 = vst.msk [vmem:[#allocation4] sm:$0xff] %vm194_vm1, %v233_v38  ;;  %v209_v42 = vld [vmem:[#allocation2 + $0x30] ss:$2 sm:$0xff]  ;;  %v217_v43 = vld [vmem:[#allocation2 + $0x31] ss:$2 sm:$0xff]  ;;  %v241_v46 = vld [vmem:[#allocation3 + $0x1] sm:$0xff]  ;;  %v1452_v36 = vpack.c.bf16 %v650_v35, %v649_v34 }
  0xf1   :  { %v221_v45 = vmax.f32 %v209_v42, %v217_v43  ;;  %v627_v37 = vld [vmem:[%s2132_s5 + $0x80] sm:$0xff]  ;;  %v628_v38 = vld [vmem:[%s2132_s5 + $0x88] sm:$0xff]  ;;  %v629_v42 = vld [vmem:[%s2132_s5 + $0x90] sm:$0xff] }
  0xf2   :  { %v275_v47 = vld [vmem:[#allocation3 + $0xb] sm:$0xff]  ;;  %v274_v48 = vld [vmem:[#allocation3 + $0x3] sm:$0xff]  ;;  %v1408_v40 = vpack.c.bf16 %v628_v38, %v627_v37  ;;  %v630_v43 = vld [vmem:[%s2132_s5 + $0x98] sm:$0xff] }
  0xf3   :  { %v242_v49 = vld [vmem:[#allocation3 + $0x9] sm:$0xff]  ;;  %284 = vrot.lane.b32.xlu1 %v275_v47, %s1518_s30  ;;  %282 = vrot.lane.b32.xlu0 %v274_v48, %s1518_s30  ;;  %232 = vst.msk [vmem:[#allocation3 + $0x22] sm:$0xff] %vm194_vm1, %v221_v45  ;;  %v1412_v45 = vpack.c.bf16 %v630_v43, %v629_v42  ;;  %v614_v47 = vld [vmem:[%s2132_s5 + $0x18] sm:$0xff]  ;;  %v631_v48 = vld [vmem:[%s2132_s5 + $0xa0] sm:$0xff] }
  0xf4   :  { %v298_v50 = vld [vmem:[#allocation3 + $0x4] sm:$0xff]  ;;  %v299_v51 = vld [vmem:[#allocation3 + $0xc] sm:$0xff]  ;;  %1409 = vmatprep.subr.bf16.mxu0 %v1408_v40 }
  0xf5   :  { %v267_v52 = vld [vmem:[#allocation3 + $0xa] sm:$0xff]  ;;  %302 = vst.msk [vmem:[#allocation4 + $0x10] sm:$0xff] %vm194_vm1, %v298_v50  ;;  %303 = vst.msk [vmem:[#allocation4 + $0x28] sm:$0xff] %vm194_vm1, %v299_v51  ;;  %v623_v38 = vld [vmem:[%s2132_s5 + $0x60] sm:$0xff] }
  0xf6   :  { %271 = vst.msk [vmem:[#allocation4 + $0x20] sm:$0xff] %vm194_vm1, %v267_v52  ;;  %v234_v53 = vld [vmem:[#allocation3 + $0x8] sm:$0xff]  ;;  %561 = vst.msk [vmem:[#allocation3] sm:$0xff] %vm194_vm1, %v1517_v9  ;;  %v235_v54 = vld [vmem:[#allocation3 + $0x18] sm:$0xff] }
  0xf7   :  { %563 = vst.msk [vmem:[#allocation3 + $0x10] sm:$0xf] %vm224_vm2, %v1517_v9  ;;  %v268_v55 = vld [vmem:[#allocation3 + $0x1a] sm:$0xff]  ;;  %251 = vrot.lane.b32.xlu1 %v242_v49, %s1518_s30  ;;  %249 = vrot.lane.b32.xlu0 %v241_v46, %s1518_s30  ;;  %v613_v46 = vld [vmem:[%s2132_s5 + $0x10] sm:$0xff]  ;;  %v632_v49 = vld [vmem:[%s2132_s5 + $0xa8] sm:$0xff] }
  0xf8   :  { %238 = vst.msk [vmem:[#allocation4 + $0x18] sm:$0xff] %vm194_vm1, %v234_v53  ;;  %562 = vst.msk [vmem:[#allocation3 + $0x8] sm:$0xff] %vm194_vm1, %v1517_v9  ;;  %v243_v56 = vld [vmem:[#allocation3 + $0x19] sm:$0xff]  ;;  %v1414_v50 = vpack.c.bf16 %v614_v47, %v613_v46  ;;  %v1416_v51 = vpack.c.bf16 %v632_v49, %v631_v48  ;;  %v616_v53 = vld [vmem:[%s2132_s5 + $0x28] sm:$0xff] }
  0xf9   :  { %239 = vst.msk [vmem:[#allocation4 + $0x30] sm:$0xff] %vm194_vm1, %v235_v54  ;;  %272 = vst.msk [vmem:[#allocation4 + $0x38] sm:$0xff] %vm194_vm1, %v268_v55  ;;  %v615_v52 = vld [vmem:[%s2132_s5 + $0x20] sm:$0xff]  ;;  %v633_v54 = vld [vmem:[%s2132_s5 + $0xb0] sm:$0xff] }
  0xfa   :  { %v276_v57 = vld [vmem:[#allocation3 + $0x1b] sm:$0xff]  ;;  %v277_v59 = vld [vmem:[#allocation3 + $0x23] sm:$0xff]  ;;  %v625_v46 = vld [vmem:[%s2132_s5 + $0x70] sm:$0xff] }
  0xfb   :  { %v244_v58 = vld [vmem:[#allocation3 + $0x21] sm:$0xff]  ;;  %253 = vrot.lane.b32.xlu1 %v243_v56, %s1518_s30  ;;  %286 = vrot.lane.b32.xlu0 %v276_v57, %s1518_s30  ;;  %v634_v55 = vld [vmem:[%s2132_s5 + $0xb8] sm:$0xff]  ;;  %v1418_v56 = vpack.c.bf16 %v616_v53, %v615_v52 }
  0xfc   :  { %v308_v60 = vld [vmem:[#allocation4 + $0x10] sm:$0xff]  ;;  %v311_v61 = vld [vmem:[#allocation4 + $0x28] sm:$0xff]  ;;  %v1420_v57 = vpack.c.bf16 %v634_v55, %v633_v54  ;;  %v640_v37 = vld [vmem:[%s2132_s5 + $0xe8] sm:$0xff] }
  0xfd   :  { %v300_v62 = vld [vmem:[#allocation3 + $0x1c] sm:$0xff]  ;;  %1300 = vmatprep.mubr.msk.f32.mxu0 %vm194_vm1, %v308_v60  ;;  %v301_v63 = vld [vmem:[#allocation3 + $0x24] sm:$0xff] }
  0xfe   :  { %304 = vst.msk [vmem:[#allocation4 + $0x40] sm:$0xff] %vm194_vm1, %v300_v62  ;;  %564 = vst.msk [vmem:[#allocation3 + $0x18] sm:$0xff] %vm194_vm1, %v1517_v9  ;;  %v236_v0 = vld [vmem:[#allocation3 + $0x20] sm:$0xff]  ;;  %1301 = vmatmul.mubr.msk.f32.vlgmr.msra.gmra.mrb[8].mxu0 %vm194_vm1, %v311_v61  ;;  %v636_v61 = vld [vmem:[%s2132_s5 + $0xc8] sm:$0xff] }
  0xff   :  { %v269_v1 = vld [vmem:[#allocation3 + $0x22] sm:$0xff]  ;;  %305 = vst.msk [vmem:[#allocation4 + $0x58] sm:$0xff] %vm194_vm1, %v301_v63  ;;  %240 = vst.msk [vmem:[#allocation4 + $0x48] sm:$0xff] %vm194_vm1, %v236_v0  ;;  %255 = vrot.lane.b32.xlu1 %v244_v58, %s1518_s30  ;;  %288 = vrot.lane.b32.xlu0 %v277_v59, %s1518_s30  ;;  %v617_v58 = vld [vmem:[%s2132_s5 + $0x30] sm:$0xff] }
 0x100   :  { %273 = vst.msk [vmem:[#allocation4 + $0x50] sm:$0xff] %vm194_vm1, %v269_v1  ;;  %565 = vst.msk [vmem:[#allocation3 + $0x20] sm:$0xff] %vm194_vm1, %v1517_v9  ;;  %1411 = vmatpush3.bf16.msra.mxu0 %v1410_v44  ;;  %v618_v59 = vld [vmem:[%s2132_s5 + $0x38] sm:$0xff]  ;;  %v635_v60 = vld [vmem:[%s2132_s5 + $0xc0] sm:$0xff] }
 0x101   :  { %566 = vst.msk [vmem:[#allocation3 + $0x28] sm:$0xf] %vm224_vm2, %v1517_v9  ;;  %1413 = vmatprep.subr.bf16.mxu0 %v1412_v45  ;;  %v1422_v62 = vpack.c.bf16 %v618_v59, %v617_v58  ;;  %v1424_v63 = vpack.c.bf16 %v636_v61, %v635_v60  ;;  %v619_v0 = vld [vmem:[%s2132_s5 + $0x40] sm:$0xff]  ;;  %v620_v1 = vld [vmem:[%s2132_s5 + $0x48] sm:$0xff]  ;;  %v626_v48 = vld [vmem:[%s2132_s5 + $0x78] sm:$0xff] }
 0x102   :  { %v624_v40 = vld [vmem:[%s2132_s5 + $0x68] sm:$0xff]  ;;  %v1438_v49 = vpack.c.bf16 %v626_v48, %v625_v46  ;;  %v1099_v46 = vld [vmem:[%s2135_s6] ss:$0 sm:$0xff] }
 0x103   :  { %v1434_v44 = vpack.c.bf16 %v624_v40, %v623_v38  ;;  %v890_v38 = vld [vmem:[%s2134_s7 + $0xc8] sm:$0xff]  ;;  %v873_v40 = vld [vmem:[%s2134_s7 + $0x40] sm:$0xff] }
 0x104   :  { %1415 = vmatpush3.bf16.msra.mxu0 %v1414_v50 }
 0x105   :  { %v314_v2 = vld [vmem:[#allocation4 + $0x40] sm:$0xff]  ;;  %1417 = vmatprep.subr.bf16.mxu0 %v1416_v51 }
 0x106   :  { %1303 = vmatprep.mubr.msk.f32.mxu0 %vm194_vm1, %v314_v2  ;;  %v317_v3 = vld [vmem:[#allocation4 + $0x58] sm:$0xff]  ;;  %v637_v2 = vld [vmem:[%s2132_s5 + $0xd0] sm:$0xff] }
 0x107   :  { %1304 = vmatmul.mubr.msk.f32.gmra.mrb[10].mxu0 %vm194_vm1, %v317_v3  ;;  %v638_v3 = vld [vmem:[%s2132_s5 + $0xd8] sm:$0xff] }
 0x108   :  { %1419 = vmatpush3.bf16.msra.mxu0 %v1418_v56 }
 0x109   :  { %1421 = vmatprep.subr.bf16.mxu0 %v1420_v57 }
 0x10c   :  { %1423 = vmatpush3.bf16.msra.mxu0 %v1422_v62 }
 0x10d   :  { %1425 = vmatprep.subr.bf16.mxu0 %v1424_v63 }
 0x165   :  { %v285_v4 = vpop.permute.xlu1 %284  ;;  %v283_v5 = vpop.permute.xlu0 %282 }
 0x166   :  { %295 = vst.msk [vmem:[#allocation4 + $0x20] sm:$0xff] %vm261_vm3, %v285_v4  ;;  %294 = vst.msk [vmem:[#allocation4 + $0x8] sm:$0xff] %vm261_vm3, %v283_v5  ;;  %v1426_v4 = vpack.c.bf16 %v620_v1, %v619_v0  ;;  %v1428_v5 = vpack.c.bf16 %v638_v3, %v637_v2 }
 0x168   :  { %1427 = vmatpush3.bf16.msra.mxu0 %v1426_v4 }
 0x169   :  { %v252_v6 = vpop.permute.xlu1 %251  ;;  %v250_v7 = vpop.permute.xlu0 %249  ;;  %1429 = vmatprep.subr.bf16.mxu0 %v1428_v5 }
 0x16a   :  { %263 = vst.msk [vmem:[#allocation4 + $0x18] sm:$0xff] %vm261_vm3, %v252_v6  ;;  %262 = vst.msk [vmem:[#allocation4] sm:$0xff] %vm261_vm3, %v250_v7  ;;  %v621_v6 = vld [vmem:[%s2132_s5 + $0x50] sm:$0xff]  ;;  %v622_v7 = vld [vmem:[%s2132_s5 + $0x58] sm:$0xff] }
 0x16d   :  { %v254_v8 = vpop.permute.xlu1 %253  ;;  %v287_v10 = vpop.permute.xlu0 %286  ;;  %v307_v11 = vld [vmem:[#allocation4 + $0x8] sm:$0xff]  ;;  %v310_v15 = vld [vmem:[#allocation4 + $0x20] sm:$0xff] }
 0x16e   :  { %264 = vst.msk [vmem:[#allocation4 + $0x30] sm:$0xff] %vm261_vm3, %v254_v8  ;;  %296 = vst.msk [vmem:[#allocation4 + $0x38] sm:$0xff] %vm261_vm3, %v287_v10  ;;  %441 = vmatprep.mubr.f32.mxu1 %v307_v11  ;;  %v1430_v8 = vpack.c.bf16 %v622_v7, %v621_v6  ;;  %v1094_v11 = vld [vmem:[%s2133_s4] ss:$0 sm:$0xff] }
 0x170   :  { %1431 = vmatpush3.bf16.msra.mxu0 %v1430_v8 }
 0x171   :  { %v256_v12 = vpop.permute.xlu1 %255  ;;  %v289_v13 = vpop.permute.xlu0 %288  ;;  %v306_v14 = vld [vmem:[#allocation4] sm:$0xff]  ;;  %v309_v16 = vld [vmem:[#allocation4 + $0x18] sm:$0xff] }
 0x172   :  { %265 = vst.msk [vmem:[#allocation4 + $0x48] sm:$0xff] %vm261_vm3, %v256_v12  ;;  %297 = vst.msk [vmem:[#allocation4 + $0x50] sm:$0xff] %vm261_vm3, %v289_v13  ;;  %442 = vmatmul.mubr.f32.vlgmr.msra.gmra.mrb[0].mxu1 %v306_v14 }
 0x173   :  { %446 = vmatprep.mubr.f32.mxu1 %v310_v15  ;;  %1443 = vmatpush3.bf16.msra.mxu1 %v1440_v27 }
 0x174   :  { %1445 = vmatprep.subr.bf16.mxu1 %v1444_v30 }
 0x175   :  { %v313_v17 = vld [vmem:[#allocation4 + $0x38] sm:$0xff]  ;;  %v312_v18 = vld [vmem:[#allocation4 + $0x30] sm:$0xff] }
 0x176   :  { %447 = vmatmul.mubr.f32.gmra.mrb[2].mxu1 %v309_v16 }
 0x177   :  { %451 = vmatprep.mubr.f32.mxu1 %v313_v17  ;;  %1447 = vmatpush3.bf16.msra.mxu1 %v1444_v30 }
 0x178   :  { %1449 = vmatprep.subr.bf16.mxu1 %v1448_v33 }
 0x179   :  { %v316_v19 = vld [vmem:[#allocation4 + $0x50] sm:$0xff]  ;;  %v315_v20 = vld [vmem:[#allocation4 + $0x48] sm:$0xff] }
 0x17a   :  { %452 = vmatmul.mubr.f32.gmra.mrb[4].mxu1 %v312_v18 }
 0x17b   :  { %456 = vmatprep.mubr.f32.mxu1 %v316_v19  ;;  %1451 = vmatpush3.bf16.msra.mxu1 %v1448_v33 }
 0x17c   :  { %1453 = vmatprep.subr.bf16.mxu1 %v1452_v36 }
 0x17e   :  { %457 = vmatmul.mubr.f32.gmra.mrb[6].mxu1 %v315_v20 }
 0x17f   :  { %1455 = vmatpush3.bf16.msra.mxu1 %v1452_v36 }
 0x1d1   :  { %v1808_v21 = vpop.f32.mrb[8].mxu0 }
 0x1d2   :  { %v1810_v22 = vpop.f32.mrb[9].mxu0 }
 0x1da   :  { %v1812_v23 = vpop.f32.mrb[10].mxu0 }
 0x1db   :  { %v1814_v24 = vpop.f32.mrb[11].mxu0 }
 0x245   :  { %v1146_v10 = vpop.f32.mrb[0].mxu1 }
 0x246   :  { %v1147_v12 = vpop.f32.mrb[1].mxu1 }
 0x247   :  { %v1148_v13 = vadd.f32 %v1147_v12, %v1146_v10  ;;  %v881_v12 = vld [vmem:[%s2134_s7 + $0x80] sm:$0xff] }
 0x249   :  { %v444_v14 = vadd.f32 %v1148_v13, %v1094_v11  ;;  %v1149_v15 = vpop.f32.mrb[2].mxu1  ;;  %v882_v13 = vld [vmem:[%s2134_s7 + $0x88] sm:$0xff] }
 0x24a   :  { %v1150_v16 = vpop.f32.mrb[3].mxu1 }
 0x24b   :  { %v529_v17 = vadd.f32 %v1810_v22, %v444_v14  ;;  %v1151_v18 = vadd.f32 %v1150_v16, %v1149_v15  ;;  %v865_v14 = vld [vmem:[%s2134_s7] sm:$0xff]  ;;  %v1456_v15 = vpack.c.bf16 %v882_v13, %v881_v12  ;;  %v866_v16 = vld [vmem:[%s2134_s7 + $0x8] sm:$0xff]  ;;  %v879_v12 = vld [vmem:[%s2134_s7 + $0x70] sm:$0xff] }
 0x24c   :  { %v880_v13 = vld [vmem:[%s2134_s7 + $0x78] sm:$0xff] }
 0x24d   :  { %v547_v19 = vmax.f32 %v529_v17, 0.0  ;;  %v449_v20 = vadd.f32 %v1151_v18, %v1094_v11  ;;  %v1152_v25 = vpop.f32.mrb[4].mxu1  ;;  %v883_v17 = vld [vmem:[%s2134_s7 + $0x90] sm:$0xff]  ;;  %v884_v18 = vld [vmem:[%s2134_s7 + $0x98] sm:$0xff]  ;;  %1457 = vmatprep.subr.bf16.mxu1 %v1456_v15  ;;  %v1486_v15 = vpack.c.bf16 %v880_v13, %v879_v12 }
 0x24e   :  { %v1153_v26 = vpop.f32.mrb[5].mxu1 }
 0x24f   :  { %551 = vst.msk [vmem:[#allocation2] sm:$0xff] %vm194_vm1, %v547_v19  ;;  %v534_v27 = vadd.f32 %v1808_v21, %v449_v20  ;;  %v1154_v28 = vadd.f32 %v1153_v26, %v1152_v25  ;;  %v639_v21 = vld [vmem:[%s2132_s5 + $0xe0] sm:$0xff]  ;;  %v1458_v19 = vpack.c.bf16 %v866_v16, %v865_v14  ;;  %v1460_v20 = vpack.c.bf16 %v884_v18, %v883_v17  ;;  %v867_v25 = vld [vmem:[%s2134_s7 + $0x10] sm:$0xff]  ;;  %v868_v26 = vld [vmem:[%s2134_s7 + $0x18] sm:$0xff] }
 0x250   :  { %v1432_v39 = vpack.c.bf16 %v640_v37, %v639_v21  ;;  %v872_v21 = vld [vmem:[%s2134_s7 + $0x38] sm:$0xff]  ;;  %v889_v37 = vld [vmem:[%s2134_s7 + $0xc0] sm:$0xff] }
 0x251   :  { %v548_v29 = vmax.f32 %v534_v27, 0.0  ;;  %v454_v30 = vadd.f32 %v1154_v28, %v1094_v11  ;;  %v1155_v31 = vpop.f32.mrb[6].mxu1  ;;  %v885_v27 = vld [vmem:[%s2134_s7 + $0xa0] sm:$0xff]  ;;  %v886_v28 = vld [vmem:[%s2134_s7 + $0xa8] sm:$0xff] }
 0x252   :  { %v1156_v32 = vpop.f32.mrb[7].mxu1  ;;  %1433 = vmatprep.subr.bf16.mxu0 %v1432_v39  ;;  %v1472_v39 = vpack.c.bf16 %v890_v38, %v889_v37  ;;  %v989_v37 = vld [vmem:[%s2136_s9 + $0x18] sm:$0xff] }
 0x253   :  { %552 = vst.msk [vmem:[#allocation2 + $0x8] sm:$0xff] %vm194_vm1, %v548_v29  ;;  %v539_v33 = vadd.f32 %v1814_v24, %v454_v30  ;;  %v1157_v34 = vadd.f32 %v1156_v32, %v1155_v31  ;;  %1435 = vmatpush3.bf16.msra.mxu0 %v1434_v44  ;;  %v1462_v29 = vpack.c.bf16 %v868_v26, %v867_v25  ;;  %v869_v31 = vld [vmem:[%s2134_s7 + $0x20] sm:$0xff]  ;;  %v870_v32 = vld [vmem:[%s2134_s7 + $0x28] sm:$0xff] }
 0x254   :  { %v1464_v30 = vpack.c.bf16 %v886_v28, %v885_v27 }
 0x255   :  { %v549_v22 = vmax.f32 %v539_v33, 0.0  ;;  %v459_v35 = vadd.f32 %v1157_v34, %v1094_v11  ;;  %v887_v33 = vld [vmem:[%s2134_s7 + $0xb0] sm:$0xff]  ;;  %v888_v34 = vld [vmem:[%s2134_s7 + $0xb8] sm:$0xff] }
 0x257   :  { %553 = vst.msk [vmem:[#allocation2 + $0x10] sm:$0xff] %vm194_vm1, %v549_v22  ;;  %v544_v36 = vadd.f32 %v1812_v23, %v459_v35  ;;  %v641_v23 = vld [vmem:[%s2132_s5 + $0xf0] sm:$0xff]  ;;  %v1466_v22 = vpack.c.bf16 %v870_v32, %v869_v31  ;;  %v1468_v35 = vpack.c.bf16 %v888_v34, %v887_v33  ;;  %v1520_v34 = vmov 0.0|0.0  }
 0x258   :  { %v1436_v45 = vpack.c.bf16 %v642_v41, %v641_v23  ;;  %v874_v23 = vld [vmem:[%s2134_s7 + $0x48] sm:$0xff]  ;;  %v891_v41 = vld [vmem:[%s2134_s7 + $0xd0] sm:$0xff] }
 0x259   :  { %v550_v24 = vmax.f32 %v544_v36, 0.0  ;;  %v871_v36 = vld [vmem:[%s2134_s7 + $0x30] sm:$0xff] }
 0x25a   :  { %v555_v42 = vld [vmem:[#allocation2] ss:$2 sm:$0xff]  ;;  %v557_v43 = vld [vmem:[#allocation2 + $0x1] ss:$2 sm:$0xff]  ;;  %1437 = vmatprep.subr.bf16.mxu0 %v1436_v45 }
 0x25b   :  { %v559_v47 = vmax.f32 %v555_v42, %v557_v43  ;;  %554 = vst.msk [vmem:[#allocation2 + $0x18] sm:$0xff] %vm194_vm1, %v550_v24  ;;  %1439 = vmatpush3.bf16.msra.mxu0 %v1438_v49  ;;  %v1470_v24 = vpack.c.bf16 %v872_v21, %v871_v36  ;;  %v892_v42 = vld [vmem:[%s2134_s7 + $0xd8] sm:$0xff]  ;;  %v1474_v43 = vpack.c.bf16 %v874_v23, %v873_v40  ;;  %v988_v36 = vld [vmem:[%s2136_s9 + $0x10] sm:$0xff] }
 0x25c   :  { %v1476_v44 = vpack.c.bf16 %v892_v42, %v891_v41  ;;  %1488 = vmatprep.subr.bf16.mxu0 %v1520_v34  ;;  %v1492_v38 = vpack.c.bf16 %v989_v37, %v988_v36  ;;  %v992_v23 = vld [vmem:[%s2136_s9 + $0x30] sm:$0xff]  ;;  %v993_v41 = vld [vmem:[%s2136_s9 + $0x38] sm:$0xff] }
 0x25d   :  { %567 = vst.msk [vmem:[#allocation3 + $0x2] sm:$0xff] %vm194_vm1, %v559_v47  ;;  %v1498_v42 = vpack.c.bf16 %v993_v41, %v992_v23 }
 0x262   :  { %v556_v50 = vld [vmem:[#allocation2 + $0x10] ss:$2 sm:$0xff]  ;;  %v558_v51 = vld [vmem:[#allocation2 + $0x11] ss:$2 sm:$0xff] }
 0x263   :  { %v560_v52 = vmax.f32 %v556_v50, %v558_v51 }
 0x264   :  { %v589_v53 = vld [vmem:[#allocation3 + $0x3] sm:$0xff] }
 0x265   :  { %v573_v54 = vld [vmem:[#allocation3 + $0x1] sm:$0xff]  ;;  %568 = vst.msk [vmem:[#allocation3 + $0x1a] sm:$0xff] %vm194_vm1, %v560_v52  ;;  %593 = vrot.lane.b32.xlu0 %v589_v53, %s1518_s30 }
 0x266   :  { %v601_v55 = vld [vmem:[#allocation3 + $0x4] sm:$0xff]  ;;  %577 = vrot.lane.b32.xlu1 %v573_v54, %s1518_s30 }
 0x267   :  { %603 = vst.msk [vmem:[#allocation4 + $0x10] sm:$0xff] %vm194_vm1, %v601_v55  ;;  %v585_v56 = vld [vmem:[#allocation3 + $0x2] sm:$0xff] }
 0x268   :  { %v569_v57 = vld [vmem:[#allocation3] sm:$0xff]  ;;  %587 = vst.msk [vmem:[#allocation4 + $0x8] sm:$0xff] %vm194_vm1, %v585_v56 }
 0x269   :  { %571 = vst.msk [vmem:[#allocation4] sm:$0xff] %vm194_vm1, %v569_v57 }
 0x26c   :  { %v590_v59 = vld [vmem:[#allocation3 + $0x1b] sm:$0xff] }
 0x26d   :  { %v574_v60 = vld [vmem:[#allocation3 + $0x19] sm:$0xff]  ;;  %595 = vrot.lane.b32.xlu0 %v590_v59, %s1518_s30 }
 0x26e   :  { %v607_v58 = vld [vmem:[#allocation4 + $0x10] sm:$0xff]  ;;  %v570_v63 = vld [vmem:[#allocation3 + $0x18] sm:$0xff]  ;;  %579 = vrot.lane.b32.xlu1 %v574_v60, %s1518_s30  ;;  %v832_v60 = vlaneseq }
 0x26f   :  { %1322 = vmatprep.mubr.msk.f32.mxu1 %vm194_vm1, %v607_v58  ;;  %v602_v61 = vld [vmem:[#allocation3 + $0x1c] sm:$0xff]  ;;  %572 = vst.msk [vmem:[#allocation4 + $0x18] sm:$0xff] %vm194_vm1, %v570_v63  ;;  %v1519_v58 = vmov 1983009808  }
 0x270   :  { %v586_v62 = vld [vmem:[#allocation3 + $0x1a] sm:$0xff]  ;;  %604 = vst.msk [vmem:[#allocation4 + $0x28] sm:$0xff] %vm194_vm1, %v602_v61  ;;  %v830_v59 = vunpack.c.l.s4 %v1519_v58  ;;  %v875_v61 = vld [vmem:[%s2134_s7 + $0x50] sm:$0xff] }
 0x271   :  { %588 = vst.msk [vmem:[#allocation4 + $0x20] sm:$0xff] %vm194_vm1, %v586_v62  ;;  %v876_v62 = vld [vmem:[%s2134_s7 + $0x58] sm:$0xff] }
 0x272   :  { %v1478_v63 = vpack.c.bf16 %v876_v62, %v875_v61  ;;  %v1102_v61 = vld [vmem:[%s2138_s8] ss:$0 sm:$0xff] }
 0x277   :  { %v610_v0 = vld [vmem:[#allocation4 + $0x28] sm:$0xff] }
 0x278   :  { %1323 = vmatmul.mubr.msk.f32.vlgmr.msra.gmra.mrb[8].mxu1 %vm194_vm1, %v610_v0  ;;  %v893_v0 = vld [vmem:[%s2134_s7 + $0xe0] sm:$0xff] }
 0x279   :  { %1459 = vmatpush3.bf16.msra.mxu1 %v1458_v19 }
 0x27a   :  { %1461 = vmatprep.subr.bf16.mxu1 %v1460_v20 }
 0x27d   :  { %1463 = vmatpush3.bf16.msra.mxu1 %v1462_v29 }
 0x27e   :  { %1465 = vmatprep.subr.bf16.mxu1 %v1464_v30 }
 0x281   :  { %1467 = vmatpush3.bf16.msra.mxu1 %v1466_v22  ;;  %v986_v22 = vld [vmem:[%s2136_s9] sm:$0xff] }
 0x282   :  { %1469 = vmatprep.subr.bf16.mxu1 %v1468_v35  ;;  %v987_v35 = vld [vmem:[%s2136_s9 + $0x8] sm:$0xff] }
 0x283   :  { %v1489_v21 = vpack.c.bf16 %v987_v35, %v986_v22 }
 0x285   :  { %1471 = vmatpush3.bf16.msra.mxu1 %v1470_v24  ;;  %v990_v24 = vld [vmem:[%s2136_s9 + $0x20] sm:$0xff] }
 0x286   :  { %1473 = vmatprep.subr.bf16.mxu1 %v1472_v39  ;;  %v991_v39 = vld [vmem:[%s2136_s9 + $0x28] sm:$0xff] }
 0x287   :  { %v1495_v40 = vpack.c.bf16 %v991_v39, %v990_v24 }
 0x289   :  { %1475 = vmatpush3.bf16.msra.mxu1 %v1474_v43  ;;  %v994_v43 = vld [vmem:[%s2136_s9 + $0x40] sm:$0xff] }
 0x28a   :  { %1477 = vmatprep.subr.bf16.mxu1 %v1476_v44  ;;  %v995_v44 = vld [vmem:[%s2136_s9 + $0x48] sm:$0xff] }
 0x28d   :  { %1479 = vmatpush3.bf16.msra.mxu1 %v1478_v63 }
 0x2d7   :  { %v594_v1 = vpop.permute.xlu0 %593 }
 0x2d8   :  { %v578_v2 = vpop.permute.xlu1 %577  ;;  %599 = vst.msk [vmem:[#allocation4 + $0x8] sm:$0xff] %vm261_vm3, %v594_v1  ;;  %v894_v1 = vld [vmem:[%s2134_s7 + $0xe8] sm:$0xff] }
 0x2d9   :  { %583 = vst.msk [vmem:[#allocation4] sm:$0xff] %vm261_vm3, %v578_v2  ;;  %v877_v2 = vld [vmem:[%s2134_s7 + $0x60] sm:$0xff] }
 0x2df   :  { %v596_v3 = vpop.permute.xlu0 %595  ;;  %v606_v4 = vld [vmem:[#allocation4 + $0x8] sm:$0xff] }
 0x2e0   :  { %v605_v5 = vld [vmem:[#allocation4] sm:$0xff]  ;;  %600 = vst.msk [vmem:[#allocation4 + $0x20] sm:$0xff] %vm261_vm3, %v596_v3  ;;  %v580_v6 = vpop.permute.xlu1 %579  ;;  %728 = vmatprep.mubr.f32.mxu0 %v606_v4  ;;  %v1480_v3 = vpack.c.bf16 %v894_v1, %v893_v0  ;;  %v878_v4 = vld [vmem:[%s2134_s7 + $0x68] sm:$0xff] }
 0x2e1   :  { %584 = vst.msk [vmem:[#allocation4 + $0x18] sm:$0xff] %vm261_vm3, %v580_v6  ;;  %729 = vmatmul.mubr.f32.vlgmr.msra.gmra.mrb[12].mxu0 %v605_v5  ;;  %v895_v5 = vld [vmem:[%s2134_s7 + $0xf0] sm:$0xff]  ;;  %v896_v6 = vld [vmem:[%s2134_s7 + $0xf8] sm:$0xff] }
 0x2e2   :  { %1481 = vmatprep.subr.bf16.mxu1 %v1480_v3  ;;  %1490 = vmatpush3.bf16.msra.mxu0 %v1489_v21 }
 0x2e3   :  { %1491 = vmatprep.subr.bf16.mxu0 %v1520_v34 }
 0x2e6   :  { %1493 = vmatpush3.bf16.msra.mxu0 %v1492_v38 }
 0x2e7   :  { %v609_v7 = vld [vmem:[#allocation4 + $0x20] sm:$0xff]  ;;  %1494 = vmatprep.subr.bf16.mxu0 %v1520_v34 }
 0x2e8   :  { %733 = vmatprep.mubr.f32.mxu0 %v609_v7  ;;  %v608_v8 = vld [vmem:[#allocation4 + $0x18] sm:$0xff]  ;;  %v831_v7 = vunpack.c.0.s8 %v830_v59  ;;  %v16_v59 = vstv %s2137_s10 }
 0x2e9   :  { %734 = vmatmul.mubr.f32.gmra.mrb[14].mxu0 %v608_v8  ;;  %v833_v8 = vshrl.u32 %v832_v60, 7  ;;  %17 = vst [vmem:[#allocation6] sm:$0x1] %v16_v59 }
 0x2ea   :  { %1496 = vmatpush3.bf16.msra.mxu0 %v1495_v40  ;;  %1357 = vmatprep.mubr.msk.f32.mxu0 %vm1521_vm6, %v1517_v9 }
 0x2eb   :  { %v834_v14 = vsub.s32 %v831_v7, %v833_v8  ;;  %1497 = vmatprep.subr.bf16.mxu0 %v1520_v34 }
 0x2ee   :  { %1499 = vmatpush3.bf16.msra.mxu0 %v1498_v42 }
 0x2ef   :  { %1500 = vmatprep.subr.bf16.mxu0 %v1520_v34 }
 0x34b   :  { %v1324_v10 = vpop.f32.mrb[8].mxu1 }
 0x34c   :  { %v805_v11 = vpop.f32.mrb[9].mxu1 }
 0x3b4   :  { %v1202_v45 = vpop.f32.mrb[12].mxu0 }
 0x3b5   :  { %v1203_v47 = vpop.f32.mrb[13].mxu0 }
 0x3b6   :  { %v1204_v48 = vadd.f32 %v1203_v47, %v1202_v45  ;;  %v1501_v45 = vpack.c.bf16 %v995_v44, %v994_v43  ;;  %v997_v47 = vld [vmem:[%s2136_s9 + $0x58] sm:$0xff] }
 0x3b8   :  { %v731_v49 = vadd.f32 %v1204_v48, %v1099_v46  ;;  %1502 = vmatpush3.bf16.msra.mxu0 %v1501_v45 }
 0x3b9   :  { %1503 = vmatprep.subr.bf16.mxu0 %v1520_v34 }
 0x3ba   :  { %v806_v50 = vadd.f32 %v805_v11, %v731_v49  ;;  %v1484_v11 = vpack.c.bf16 %v896_v6, %v895_v5 }
 0x3bc   :  { %v814_v51 = vmax.f32 %v806_v50, 0.0  ;;  %v1205_v52 = vpop.f32.mrb[14].mxu0 }
 0x3bd   :  { %v1206_v53 = vpop.f32.mrb[15].mxu0 }
 0x3be   :  { %816 = vst.msk [vmem:[#allocation2] sm:$0xff] %vm194_vm1, %v814_v51  ;;  %v1207_v54 = vadd.f32 %v1206_v53, %v1205_v52  ;;  %v998_v53 = vld [vmem:[%s2136_s9 + $0x60] sm:$0xff] }
 0x3c0   :  { %v736_v55 = vadd.f32 %v1207_v54, %v1099_v46  ;;  %v996_v46 = vld [vmem:[%s2136_s9 + $0x50] sm:$0xff]  ;;  %v999_v54 = vld [vmem:[%s2136_s9 + $0x68] sm:$0xff] }
 0x3c1   :  { %v1504_v48 = vpack.c.bf16 %v997_v47, %v996_v46 }
 0x3c2   :  { %v811_v56 = vadd.f32 %v1324_v10, %v736_v55  ;;  %v1482_v10 = vpack.c.bf16 %v878_v4, %v877_v2  ;;  %v1507_v55 = vpack.c.bf16 %v999_v54, %v998_v53  ;;  %v1104_v2 = vld [vmem:[#allocation6] ss:$0 sm:$0xff] }
 0x3c3   :  { %1505 = vmatpush3.bf16.msra.mxu0 %v1504_v48 }
 0x3c4   :  { %v815_v57 = vmax.f32 %v811_v56, 0.0  ;;  %1483 = vmatpush3.bf16.msra.mxu1 %v1482_v10  ;;  %1506 = vmatprep.subr.bf16.mxu0 %v1520_v34  ;;  %v1000_v56 = vld [vmem:[%s2136_s9 + $0x70] sm:$0xff] }
 0x3c5   :  { %1485 = vmatprep.subr.bf16.mxu1 %v1484_v11 }
 0x3c6   :  { %817 = vst.msk [vmem:[#allocation2 + $0x8] sm:$0xff] %vm194_vm1, %v815_v57  ;;  %v1001_v57 = vld [vmem:[%s2136_s9 + $0x78] sm:$0xff] }
 0x3c7   :  { %1508 = vmatpush3.bf16.msra.mxu0 %v1507_v55  ;;  %v1510_v58 = vpack.c.bf16 %v1001_v57, %v1000_v56 }
 0x3c8   :  { %1487 = vmatpush3.bf16.msra.mxu1 %v1486_v15  ;;  %1509 = vmatprep.subr.bf16.mxu0 %v1520_v34 }
 0x3cb   :  { %1511 = vmatpush3.bf16.msra.mxu0 %v1510_v58 }
 0x3cd   :  { %v848_v16 = vld [vmem:[#allocation2 + $0x6] ss:$8 sm:$0x3]  ;;  %v850_v17 = vld [vmem:[#allocation2 + $0x7] ss:$8 sm:$0x3] }
 0x3ce   :  { %v851_v18 = vmax.f32 %v848_v16, %v850_v17  ;;  %v824_v19 = vld [vmem:[#allocation2 + $0x2] ss:$8 sm:$0x3]  ;;  %v826_v20 = vld [vmem:[#allocation2 + $0x3] ss:$8 sm:$0x3] }
 0x3cf   :  { %v827_v25 = vmax.f32 %v824_v19, %v826_v20  ;;  %v842_v26 = vld [vmem:[#allocation2 + $0x4] ss:$8 sm:$0x3]  ;;  %v844_v27 = vld [vmem:[#allocation2 + $0x5] ss:$8 sm:$0x3] }
 0x3d0   :  { %v859_v28 = vrot.slane %v851_v18, %v834_v14  ;;  %v845_v29 = vmax.f32 %v842_v26, %v844_v27  ;;  %v818_v30 = vld [vmem:[#allocation2] ss:$8 sm:$0x3]  ;;  %v819_v31 = vld [vmem:[#allocation2 + $0x1] ss:$8 sm:$0x3] }
 0x3d1   :  { %v835_v32 = vrot.slane %v827_v25, %v834_v14  ;;  %v820_v33 = vmax.f32 %v818_v30, %v819_v31 }
 0x3d2   :  { %860 = vrot.lane.b32.xlu1 %v859_v28, %s1518_s30  ;;  %846 = vst.msk [vmem:[#allocation5 + $0x2] sm:$0x3] %vm821_vm4, %v845_v29 }
 0x3d3   :  { %836 = vrot.lane.b32.xlu0 %v835_v32, %s1518_s30  ;;  %822 = vst.msk [vmem:[#allocation5] sm:$0x3] %vm821_vm4, %v820_v33 }
 0x444   :  { %v861_v49 = vpop.permute.xlu1 %860 }
 0x445   :  { %863 = vst.msk [vmem:[#allocation5 + $0x2] sm:$0x3] %vm839_vm5, %v861_v49  ;;  %v837_v50 = vpop.permute.xlu0 %836 }
 0x446   :  { %840 = vst.msk [vmem:[#allocation5] sm:$0x3] %vm839_vm5, %v837_v50 }
 0x44d   :  { %v1103_v51 = vld.sshfl [vmem:[#allocation5] sm:$0x33 pattern:$0x76325410] }
 0x44e   :  { %v912_v52 = vcombine.high %v1103_v51, %v1103_v51 }
 0x450   :  { %979 = vmatprep.mubr.f32.mxu1 %v912_v52 }
 0x451   :  { %980 = vmatmul.mubr.f32.vlgmr.msra.gmra.mrb[10].mxu1 %v1103_v51 }
 0x524   :  { %v1250_v60 = vpop.f32.mrb[10].mxu1 }
 0x525   :  { %v1251_v62 = vpop.f32.mrb[11].mxu1 }
 0x526   :  { %v1252_v63 = vadd.f32 %v1251_v62, %v1250_v60 }
 0x528   :  { %v982_v0 = vadd.f32 %v1252_v63, %v1102_v61 }
 0x52a   :  { %v985_v1 = vmax.f32 %v982_v0, 0.0 }
 0x52c   :  { %1358 = vmatmul.mubr.f32.vlgmr.msra.gmra.mrb[16].mxu0 %v985_v1 }
 0x5ff   :  { %v1075_v3 = vpop.f32.mrb[16].mxu0 }
 0x600   :  { %v1076_v4 = vadd.f32 %v1104_v2, %v1075_v3  ;;  %v1359_v9 = vpop.f32.mrb[17].mxu0 }
 0x602   :  { %1080 = vst.msk [vmem:[%s2139_s11] sm:$0x3] %vm1079_vm7, %v1076_v4 }

</bundles_post_ra>
